<compile_context>
chip_gen: v7x
topology: tpu7x:2x2x1
jax: 0.10.0
libtpu: 0.0.40
codegen_flags: <defaults>
</compile_context>

<pallas_src>
import math
import jax
import jax.numpy as jnp
from jax.experimental import pallas as pl
from jax.experimental.pallas import tpu as pltpu

# Small config consistent with MSA2(nhid, nhead, head_dim)
NHID = 32
NHEAD = 4
HEAD_DIM = 8
D = NHEAD * HEAD_DIM  # nhead * head_dim = 32
B = 2
L = 16


def msa2_kernel(x_ref, y_ref, wq_ref, bq_ref, wk_ref, bk_ref, wo_ref, bo_ref,
                sel_ref, selt_ref, o_ref):
    b, _ = x_ref.shape          # (B, NHID)
    bl, _ = y_ref.shape         # (B*L, NHID)
    l = bl // b
    d, nhead = sel_ref.shape    # (D, NHEAD)
    head_dim = d // nhead

    x = x_ref[...]              # (B, NHID)
    y = y_ref[...]              # (B*L, NHID)
    sel = sel_ref[...]          # (D, NHEAD)  0/1: column h selects head h's channels
    selt = selt_ref[...]        # (NHEAD, D)

    # 1x1 convolutions == channel matmuls; whole batch in one MXU push each.
    q = jnp.dot(x, wq_ref[...], preferred_element_type=jnp.float32) + bq_ref[...]    # (B, D)
    k = jnp.dot(y, wk_ref[...], preferred_element_type=jnp.float32) + bk_ref[...]    # (B*L, D)

    # Broadcast each batch row of q across its L memory rows (sublane broadcast + no-op reshape).
    qe = jnp.broadcast_to(q[:, None, :], (b, l, d)).reshape(bl, d)                   # (B*L, D)

    # All-head attention scores in one shot: VPU elementwise + a single MXU push.
    scale = 1.0 / math.sqrt(head_dim)
    s = jnp.dot(qe * k, sel, preferred_element_type=jnp.float32) * scale             # (B*L, NHEAD)

    # Softmax over L per (batch, head): single max/sum over the head-batched block.
    s3 = s.reshape(b, l, nhead)
    m = jnp.max(s3, axis=1, keepdims=True)                                           # (B, 1, NHEAD)
    e = jnp.exp(s3 - m)
    denom = jnp.sum(e, axis=1, keepdims=True)                                        # (B, 1, NHEAD)
    a = e * pl.reciprocal(denom, approx=True)                                        # (B, L, NHEAD)

    # v == k (the PyTorch module overwrites v with k.permute, so WV is dead code).
    # Expand per-head weights back to D lanes via sel^T (one MXU push), weight k on
    # the VPU, reduce over L on the XLU.
    a_exp = jnp.dot(a.reshape(bl, nhead), selt, preferred_element_type=jnp.float32)  # (B*L, D)
    att = jnp.sum((a_exp * k).reshape(b, l, d), axis=1)                              # (B, D)

    # WO projection + bias for the whole batch: one MXU push, one lane-dense store.
    o_ref[...] = jnp.dot(att, wo_ref[...], preferred_element_type=jnp.float32) + bo_ref[...]


def msa2_forward(x_nchw, y_nchw, params):
    wq, bq, wk, bk, wo, bo = params
    Bb = x_nchw.shape[0]
    nhid = x_nchw.shape[1]
    Ll = y_nchw.shape[2]

    # NCHW -> lane-dense 2-D kernel layouts.
    x2 = x_nchw[:, :, 0, 0]                                                    # (B, NHID)
    y2 = jnp.transpose(y_nchw[:, :, :, 0], (0, 2, 1)).reshape(Bb * Ll, nhid)   # (B*L, NHID)

    # Constant 0/1 head-selector matrices (channel d belongs to head d // HEAD_DIM).
    head_of_d = jnp.arange(D, dtype=jnp.int32) // HEAD_DIM
    sel = (head_of_d[:, None] == jnp.arange(NHEAD, dtype=jnp.int32)[None, :]).astype(jnp.float32)
    selt = jnp.transpose(sel)

    vmem = pl.BlockSpec(memory_space=pltpu.MemorySpace.VMEM)
    out = pl.pallas_call(
        msa2_kernel,
        out_shape=jax.ShapeDtypeStruct((Bb, nhid), jnp.float32),
        in_specs=[vmem] * 10,
        out_specs=vmem,
    )(x2, y2, wq, bq, wk, bk, wo, bo, sel, selt)

    return out.reshape(Bb, nhid, 1, 1)   # back to NCHW


def msa2_ref(x_nchw, y_nchw, params):
    """Pure-JAX reference mirroring the PyTorch forward."""
    wq, bq, wk, bk, wo, bo = params
    Bb = x_nchw.shape[0]
    Ll = y_nchw.shape[2]
    xq = x_nchw[:, :, 0, 0]                               # (B, NHID)
    yk = jnp.transpose(y_nchw[:, :, :, 0], (0, 2, 1))     # (B, L, NHID)
    q = xq @ wq + bq[0]                                   # (B, D)
    k = jnp.einsum('bln,nd->bld', yk, wk) + bk[0]         # (B, L, D)
    qh = q.reshape(Bb, NHEAD, HEAD_DIM)
    kh = k.reshape(Bb, Ll, NHEAD, HEAD_DIM)
    pre = jnp.einsum('bhd,blhd->bhl', qh, kh) / math.sqrt(HEAD_DIM)
    a = jax.nn.softmax(pre, axis=-1)
    att = jnp.einsum('bhl,blhd->bhd', a, kh).reshape(Bb, NHEAD * HEAD_DIM)
    out = att @ wo + bo[0]
    return out.reshape(Bb, NHID, 1, 1)


if __name__ == "__main__":
    key = jax.random.PRNGKey(0)
    keys = jax.random.split(key, 10)

    x = jax.random.normal(keys[0], (B, NHID, 1, 1), jnp.float32)
    y = jax.random.normal(keys[1], (B, NHID, L, 1), jnp.float32)

    sc_in = 1.0 / math.sqrt(NHID)
    wq = jax.random.normal(keys[2], (NHID, D), jnp.float32) * sc_in
    bq = jax.random.normal(keys[3], (1, D), jnp.float32) * 0.01
    wk = jax.random.normal(keys[4], (NHID, D), jnp.float32) * sc_in
    bk = jax.random.normal(keys[5], (1, D), jnp.float32) * 0.01
    wo = jax.random.normal(keys[6], (D, NHID), jnp.float32) * (1.0 / math.sqrt(D))
    bo = jax.random.normal(keys[7], (1, NHID), jnp.float32) * 0.01
    # WV parameters exist in the module but its output is dead code (v = k.permute(...)):
    _wv_unused = jax.random.normal(keys[8], (NHID, D), jnp.float32) * sc_in

    params = (wq, bq, wk, bk, wo, bo)

    out = jax.jit(msa2_forward)(x, y, params)
    jax.block_until_ready(out)

    ref = msa2_ref(x, y, params)
    assert out.shape == (B, NHID, 1, 1)
    # Tolerance loosened slightly because the softmax denominator uses the EUP
    # approximate reciprocal (pl.reciprocal(approx=True), ~2^-12 relative error).
    assert jnp.allclose(out, ref, rtol=2e-3, atol=2e-3), "mismatch vs reference"

    print("KERNEL_OK")
</pallas_src>

<mosaic_0001>
module attributes {stable_mosaic.version = 11 : i64} {
  func.func @msa2_kernel(%arg0: memref<2x32xf32, #tpu.memory_space<vmem>>, %arg1: memref<32x32xf32, #tpu.memory_space<vmem>>, %arg2: memref<32x32xf32, #tpu.memory_space<vmem>>, %arg3: memref<1x32xf32, #tpu.memory_space<vmem>>, %arg4: memref<32x32xf32, #tpu.memory_space<vmem>>, %arg5: memref<1x32xf32, #tpu.memory_space<vmem>>, %arg6: memref<32x32xf32, #tpu.memory_space<vmem>>, %arg7: memref<1x32xf32, #tpu.memory_space<vmem>>, %arg8: memref<32x4xf32, #tpu.memory_space<vmem>>, %arg9: memref<4x32xf32, #tpu.memory_space<vmem>>, %arg10: memref<2x32xf32, #tpu.memory_space<vmem>>) attributes {dimension_semantics = [], scalar_prefetch = 0 : i64, scratch_operands = 0 : i64, tpu.core_type = #tpu.core_type<tc>} {
    %c0 = arith.constant 0 : index
    %c0_0 = arith.constant 0 : index
    %0 = vector.load %arg0[%c0, %c0_0] : memref<2x32xf32, #tpu.memory_space<vmem>>, vector<2x32xf32>
    %c0_1 = arith.constant 0 : index
    %c0_2 = arith.constant 0 : index
    %1 = vector.load %arg1[%c0_1, %c0_2] : memref<32x32xf32, #tpu.memory_space<vmem>>, vector<32x32xf32>
    %c0_3 = arith.constant 0 : index
    %c0_4 = arith.constant 0 : index
    %2 = vector.load %arg8[%c0_3, %c0_4] : memref<32x4xf32, #tpu.memory_space<vmem>>, vector<32x4xf32>
    %c0_5 = arith.constant 0 : index
    %c0_6 = arith.constant 0 : index
    %3 = vector.load %arg9[%c0_5, %c0_6] : memref<4x32xf32, #tpu.memory_space<vmem>>, vector<4x32xf32>
    %c0_7 = arith.constant 0 : index
    %c0_8 = arith.constant 0 : index
    %4 = vector.load %arg2[%c0_7, %c0_8] : memref<32x32xf32, #tpu.memory_space<vmem>>, vector<32x32xf32>
    %cst = arith.constant dense<0.000000e+00> : vector<2x32xf32>
    %5 = tpu.matmul %0, %4, %cst {dimension_numbers = #tpu.dot_dimension_numbers<[1], [0], [0], [1], [0, 0, 1, 1], [], []>} : vector<2x32xf32>, vector<32x32xf32>, vector<2x32xf32> -> vector<2x32xf32>
    %c0_9 = arith.constant 0 : index
    %c0_10 = arith.constant 0 : index
    %6 = vector.load %arg3[%c0_9, %c0_10] : memref<1x32xf32, #tpu.memory_space<vmem>>, vector<1x32xf32>
    %7 = vector.broadcast %6 : vector<1x32xf32> to vector<2x32xf32>
    %8 = arith.addf %5, %7 : vector<2x32xf32>
    %c0_11 = arith.constant 0 : index
    %c0_12 = arith.constant 0 : index
    %9 = vector.load %arg4[%c0_11, %c0_12] : memref<32x32xf32, #tpu.memory_space<vmem>>, vector<32x32xf32>
    %cst_13 = arith.constant dense<0.000000e+00> : vector<32x32xf32>
    %10 = tpu.matmul %1, %9, %cst_13 {dimension_numbers = #tpu.dot_dimension_numbers<[1], [0], [0], [1], [0, 0, 1, 1], [], []>} : vector<32x32xf32>, vector<32x32xf32>, vector<32x32xf32> -> vector<32x32xf32>
    %c0_14 = arith.constant 0 : index
    %c0_15 = arith.constant 0 : index
    %11 = vector.load %arg5[%c0_14, %c0_15] : memref<1x32xf32, #tpu.memory_space<vmem>>, vector<1x32xf32>
    %12 = vector.broadcast %11 : vector<1x32xf32> to vector<32x32xf32>
    %13 = arith.addf %10, %12 : vector<32x32xf32>
    %14 = vector.shape_cast %8 : vector<2x32xf32> to vector<2x1x32xf32>
    %15 = vector.shape_cast %14 : vector<2x1x32xf32> to vector<2x1x32xf32>
    %16 = vector.broadcast %15 : vector<2x1x32xf32> to vector<2x16x32xf32>
    %17 = vector.shape_cast %16 : vector<2x16x32xf32> to vector<32x32xf32>
    %18 = arith.mulf %17, %13 : vector<32x32xf32>
    %cst_16 = arith.constant dense<0.000000e+00> : vector<32x4xf32>
    %19 = tpu.matmul %18, %2, %cst_16 {dimension_numbers = #tpu.dot_dimension_numbers<[1], [0], [0], [1], [0, 0, 1, 1], [], []>} : vector<32x32xf32>, vector<32x4xf32>, vector<32x4xf32> -> vector<32x4xf32>
    %cst_17 = arith.constant 0.353553385 : f32
    %20 = vector.broadcast %cst_17 : f32 to vector<32x4xf32>
    %21 = arith.mulf %19, %20 : vector<32x4xf32>
    %22 = vector.shape_cast %21 : vector<32x4xf32> to vector<2x16x4xf32>
    %cst_18 = arith.constant dense<0xFF800000> : vector<2x4xf32>
    %23 = vector.multi_reduction <maximumf>, %22, %cst_18 [1] : vector<2x16x4xf32> to vector<2x4xf32>
    %24 = vector.shape_cast %23 : vector<2x4xf32> to vector<2x1x4xf32>
    %25 = vector.broadcast %24 : vector<2x1x4xf32> to vector<2x16x4xf32>
    %26 = arith.subf %22, %25 : vector<2x16x4xf32>
    %27 = math.exp %26 : vector<2x16x4xf32>
    %cst_19 = arith.constant dense<0.000000e+00> : vector<2x4xf32>
    %28 = vector.multi_reduction <add>, %27, %cst_19 [1] : vector<2x16x4xf32> to vector<2x4xf32>
    %29 = vector.shape_cast %28 : vector<2x4xf32> to vector<2x1x4xf32>
    %30 = tpu.reciprocal %29 {approx = true} : vector<2x1x4xf32> -> vector<2x1x4xf32>
    %31 = vector.broadcast %30 : vector<2x1x4xf32> to vector<2x16x4xf32>
    %32 = arith.mulf %27, %31 : vector<2x16x4xf32>
    %33 = vector.shape_cast %32 : vector<2x16x4xf32> to vector<32x4xf32>
    %cst_20 = arith.constant dense<0.000000e+00> : vector<32x32xf32>
    %34 = tpu.matmul %33, %3, %cst_20 {dimension_numbers = #tpu.dot_dimension_numbers<[1], [0], [0], [1], [0, 0, 1, 1], [], []>} : vector<32x4xf32>, vector<4x32xf32>, vector<32x32xf32> -> vector<32x32xf32>
    %35 = arith.mulf %34, %13 : vector<32x32xf32>
    %36 = vector.shape_cast %35 : vector<32x32xf32> to vector<2x16x32xf32>
    %cst_21 = arith.constant dense<0.000000e+00> : vector<2x32xf32>
    %37 = vector.multi_reduction <add>, %36, %cst_21 [1] : vector<2x16x32xf32> to vector<2x32xf32>
    %c0_22 = arith.constant 0 : index
    %c0_23 = arith.constant 0 : index
    %38 = vector.load %arg6[%c0_22, %c0_23] : memref<32x32xf32, #tpu.memory_space<vmem>>, vector<32x32xf32>
    %cst_24 = arith.constant dense<0.000000e+00> : vector<2x32xf32>
    %39 = tpu.matmul %37, %38, %cst_24 {dimension_numbers = #tpu.dot_dimension_numbers<[1], [0], [0], [1], [0, 0, 1, 1], [], []>} : vector<2x32xf32>, vector<32x32xf32>, vector<2x32xf32> -> vector<2x32xf32>
    %c0_25 = arith.constant 0 : index
    %c0_26 = arith.constant 0 : index
    %40 = vector.load %arg7[%c0_25, %c0_26] : memref<1x32xf32, #tpu.memory_space<vmem>>, vector<1x32xf32>
    %41 = vector.broadcast %40 : vector<1x32xf32> to vector<2x32xf32>
    %42 = arith.addf %39, %41 : vector<2x32xf32>
    %c0_27 = arith.constant 0 : index
    %c0_28 = arith.constant 0 : index
    %43 = vector.load %arg10[%c0_27, %c0_28] : memref<2x32xf32, #tpu.memory_space<vmem>>, vector<2x32xf32>
    tpu.vector_store %arg10[%c0_27, %c0_28], %42 {strides = array<i32>} : memref<2x32xf32, #tpu.memory_space<vmem>>, vector<2x32xf32>,
    return
  }
}

</mosaic_0001>

<bundles_post_ra>
// kernel: msa2_forward.1
= control target key start
LH: loop header
LB: loop body
LE: loop exit
PB: predicated region body
PF: predicated region fallthrough
CT: control target
= control target key end

     0   :  { %15 = vsyncpa [#allocation3], 0  ;;  %s1215_s0 = inlined_call_operand.hbm [shape: f32[2,32], index: 0, kind: input, shape index: {}]   ;;  %s1216_s1 = inlined_call_operand.vmem [shape: f32[32,32], index: 1, kind: input, shape index: {}]   ;;  %s1217_s2 = inlined_call_operand.hbm [shape: f32[32,32], index: 2, kind: input, shape index: {}]   ;;  %s1218_s3 = inlined_call_operand.hbm [shape: f32[1,32], index: 3, kind: input, shape index: {}]   ;;  %s1219_s4 = inlined_call_operand.vmem [shape: f32[32,32], index: 4, kind: input, shape index: {}]   ;;  %s1220_s5 = inlined_call_operand.vmem [shape: f32[1,32], index: 5, kind: input, shape index: {}]   ;;  %s1221_s6 = inlined_call_operand.hbm [shape: f32[32,32], index: 6, kind: input, shape index: {}]   ;;  %s1222_s7 = inlined_call_operand.vmem [shape: f32[1,32], index: 7, kind: input, shape index: {}]   ;;  %s1223_s8 = inlined_call_operand.vmem [shape: f32[32,4], index: 8, kind: input, shape index: {}]   ;;  %s1224_s9 = inlined_call_operand.vmem [shape: f32[4,32], index: 9, kind: input, shape index: {}]   ;;  %s1225_s10 = inlined_call_operand.hbm [shape: f32[2,32], index: 10, kind: output, shape index: {}]  }
   0x1   :  { %16 = vsyncpa [#allocation6], 0 }
   0x2   :  { %17 = vsyncpa [#allocation9], 0 }
   0x3   :  { %18 = vsyncpa [#allocation4], 0  ;;  %s988_s13 = smov [#allocation5]   ;;  %s870_s17 = scalar_lea.hbm %s1217_s2, 512 }
   0x4   :  { %s36_s14 = sshll.u32 %s988_s13, 4  ;;  %p871_p0 = scmp.ne.s32.totalorder %s1217_s2, %s870_s17  ;;  %s37_s14 = int_to_ptr.vmem [resolvable:$true] %s36_s14 }
   0x5   :  { %p874_p1 = scmp.lt.u32.totalorder %s870_s17, %s1217_s2 }
   0x7   :  { %p876_p2 = pnand %p874_p1, %p871_p0 }
   0x9   :  { %879 = shalt.err (!%p876_p2)
}
   0xa   :  { %s880_s22 = scalar_lea.vmem %s37_s14, 512  ;;  %p885_p4 = scmp.lt.s32.totalorder %s37_s14, %s37_s14 }
   0xb   :  { %p881_p3 = scmp.ne.s32.totalorder %s37_s14, %s880_s22  ;;  %p886_p5 = scmp.lt.s32.totalorder %s880_s22, %s880_s22 }
   0xd   :  { %p887_p6 = por %p886_p5, %p885_p4 }
   0xf   :  { %p888_p7 = pnand %p887_p6, %p881_p3 }
  0x11   :  { %891 = shalt.err (!%p888_p7)
}
  0x12   :  { %s989_s23 = smov 128   ;;  %s990_s24 = smov 8  }
  0x13   :  { %42 = dma.hbm_to_vmem [thread:$0]  %s1217_s2, 512, %s37_s14, [#allocation6], %s989_s23, %s989_s23, %s990_s24  }
  0x14   :  { %s991_s27 = smov [#allocation2]   ;;  %s992_s29 = smov [#allocation7]  }
  0x15   :  { %s25_s28 = sshll.u32 %s991_s27, 4  ;;  %s49_s30 = sshll.u32 %s992_s29, 4  ;;  %s26_s28 = int_to_ptr.vmem [resolvable:$true] %s25_s28  ;;  %s50_s30 = int_to_ptr.vmem [resolvable:$true] %s49_s30 }
  0x16   :  { %s892_s13 = scalar_lea.hbm %s1215_s0, 32 }
  0x17   :  { %p893_p8 = scmp.ne.s32.totalorder %s1215_s0, %s892_s13  ;;  %p896_p9 = scmp.lt.u32.totalorder %s892_s13, %s1215_s0 }
  0x19   :  { %p898_p10 = pnand %p896_p9, %p893_p8 }
  0x1b   :  { %901 = shalt.err (!%p898_p10)
}
  0x1c   :  { %s902_s2 = scalar_lea.vmem %s26_s28, 32  ;;  %p907_p12 = scmp.lt.s32.totalorder %s26_s28, %s26_s28 }
  0x1d   :  { %p903_p11 = scmp.ne.s32.totalorder %s26_s28, %s902_s2  ;;  %p908_p13 = scmp.lt.s32.totalorder %s902_s2, %s902_s2 }
  0x1f   :  { %p909_p0 = por %p908_p13, %p907_p12 }
  0x21   :  { %p910_p1 = pnand %p909_p0, %p903_p11 }
  0x23   :  { %913 = shalt.err (!%p910_p1)
}
  0x24   :  { %28 = dma.hbm_to_vmem [thread:$0]  %s1215_s0, 32, %s26_s28, [#allocation3]  }
  0x25   :  { %s914_s22 = scalar_lea.hbm %s1218_s3, 16 }
  0x26   :  { %p915_p2 = scmp.ne.s32.totalorder %s1218_s3, %s914_s22  ;;  %p918_p3 = scmp.lt.u32.totalorder %s914_s22, %s1218_s3 }
  0x28   :  { %p920_p4 = pnand %p918_p3, %p915_p2 }
  0x2a   :  { %923 = shalt.err (!%p920_p4)
}
  0x2b   :  { %s924_s11 = scalar_lea.vmem %s50_s30, 16  ;;  %s928_s12 = scalar_lea.vmem %s50_s30, 32 }
  0x2c   :  { %p925_p5 = scmp.ne.s32.totalorder %s50_s30, %s924_s11  ;;  %p929_p6 = scmp.lt.s32.totalorder %s50_s30, %s50_s30 }
  0x2d   :  { %p930_p7 = scmp.lt.s32.totalorder %s928_s12, %s924_s11 }
  0x2f   :  { %p931_p8 = por %p930_p7, %p929_p6 }
  0x31   :  { %p932_p9 = pnand %p931_p8, %p925_p5 }
  0x33   :  { %935 = shalt.err (!%p932_p9)
}
  0x34   :  { %52 = dma.hbm_to_vmem [thread:$0]  %s1218_s3, 16, %s50_s30, [#allocation6]  }
  0x35   :  { %s993_s13 = smov [#allocation8]   ;;  %s936_s18 = scalar_lea.hbm %s1221_s6, 512 }
  0x36   :  { %s62_s15 = sshll.u32 %s993_s13, 4  ;;  %p937_p10 = scmp.ne.s32.totalorder %s1221_s6, %s936_s18  ;;  %s63_s15 = int_to_ptr.vmem [resolvable:$true] %s62_s15 }
  0x37   :  { %p940_p11 = scmp.lt.u32.totalorder %s936_s18, %s1221_s6 }
  0x39   :  { %p942_p12 = pnand %p940_p11, %p937_p10 }
  0x3b   :  { %945 = shalt.err (!%p942_p12)
}
  0x3c   :  { %s946_s21 = scalar_lea.vmem %s63_s15, 512  ;;  %p951_p0 = scmp.lt.s32.totalorder %s63_s15, %s63_s15 }
  0x3d   :  { %p947_p13 = scmp.ne.s32.totalorder %s63_s15, %s946_s21  ;;  %p952_p1 = scmp.lt.s32.totalorder %s946_s21, %s946_s21 }
  0x3f   :  { %p953_p2 = por %p952_p1, %p951_p0 }
  0x41   :  { %p954_p3 = pnand %p953_p2, %p947_p13 }
  0x43   :  { %957 = shalt.err (!%p954_p3)
}
  0x44   :  { %68 = dma.hbm_to_vmem [thread:$0]  %s1221_s6, 512, %s63_s15, [#allocation9], %s989_s23, %s989_s23, %s990_s24  }
  0x45   :  { %980 = dma.done.wait [#allocation3], 32  }
  0x46   :  { %981 = vsyncadd [#allocation3], 4294967264 }
  0x47   :  { %982 = dma.done.wait [#allocation6], 528  }
  0x48   :  { %983 = vsyncadd [#allocation6], 4294966768 }
  0x49   :  { %984 = dma.done.wait [#allocation9], 512  }
  0x4a   :  { %985 = vsyncadd [#allocation9], 4294966784  ;;  %v994_v0 = vmov 0.0|0.0   ;;  %vm995_vm0 = vmmov 0   ;;  %v996_v1 = vmov 0.0   ;;  %v97_v2 = vld [vmem:[#allocation5] sm:$0xff]  ;;  %v294_v27 = vlaneseq }
  0x4b   :  { %819 = vmatprep.subr.bf16.mxu0 %v994_v0  ;;  %769 = vmatprep.mubr.msk.f32.mxu0 %vm995_vm0, %v996_v1  ;;  %v98_v3 = vld [vmem:[#allocation5 + $0x8] sm:$0xff]  ;;  %v182_v4 = vld [vmem:[%s1219_s4] sm:$0xff]  ;;  %v99_v7 = vld [vmem:[#allocation5 + $0x10] sm:$0xff]  ;;  %vm108_vm1 = vcmask 261120   ;;  %v997_v25 = vmov 1966171168  }
  0x4c   :  { %v820_v5 = vpack.c.bf16 %v98_v3, %v97_v2  ;;  %v183_v6 = vld [vmem:[%s1219_s4 + $0x8] sm:$0xff]  ;;  %v100_v8 = vld [vmem:[#allocation5 + $0x18] sm:$0xff]  ;;  %v184_v10 = vld [vmem:[%s1219_s4 + $0x10] sm:$0xff]  ;;  %v292_v26 = vunpack.c.l.s4 %v997_v25  ;;  %v295_v29 = vshrl.u32 %v294_v27, 7  ;;  %vm495_vm2 = vcmask 1043456   ;;  %s998_s25 = smov [#allocation10]  }
  0x4d   :  { %v825_v9 = vpack.c.bf16 %v183_v6, %v182_v4  ;;  %v185_v11 = vld [vmem:[%s1219_s4 + $0x18] sm:$0xff]  ;;  %v823_v12 = vpack.c.bf16 %v100_v8, %v99_v7  ;;  %v88_v14 = vld [vmem:[%s1216_s1] sm:$0xff]  ;;  %v89_v16 = vld [vmem:[%s1216_s1 + $0x8] sm:$0xff]  ;;  %vm428_vm3 = vcmask 31744   ;;  %vm619_vm4 = vcmask 1041409   ;;  %s701_s6 = sshll.u32 %s998_s25, 4  ;;  %s702_s6 = int_to_ptr.vmem [resolvable:$true] %s701_s6 }
  0x4e   :  { %821 = vmatpush3.bf16.msra.mxu0 %v820_v5  ;;  %v829_v13 = vpack.c.bf16 %v185_v11, %v184_v10  ;;  %780 = vmatprep.mubr.msk.f32.mxu1 %vm108_vm1, %v88_v14  ;;  %v87_v15 = vld [vmem:[#allocation2] sm:$0x3]  ;;  %v90_v17 = vld [vmem:[%s1216_s1 + $0x10] sm:$0xff]  ;;  %v91_v18 = vld [vmem:[%s1216_s1 + $0x18] sm:$0xff]  ;;  %v293_v28 = vunpack.c.0.s8 %v292_v26  ;;  %v315_v38 = vsub.s32 0, %v295_v29  ;;  %vm693_vm5 = vcmask 254976   ;;  %p963_p5 = scmp.lt.s32.totalorder %s702_s6, %s702_s6 }
  0x4f   :  { %826 = vmatprep.subr.bf16.mxu1 %v825_v9  ;;  %822 = vmatprep.subr.bf16.mxu0 %v994_v0  ;;  %v92_v19 = vld [vmem:[%s1223_s8] sm:$0xff]  ;;  %v93_v20 = vld [vmem:[%s1223_s8 + $0x8] sm:$0xff]  ;;  %v94_v22 = vld [vmem:[%s1223_s8 + $0x10] sm:$0xff]  ;;  %s958_s23 = scalar_lea.vmem %s702_s6, 32 }
  0x50   :  { %828 = vmatpush3.bf16.msra.mxu1 %v825_v9  ;;  %v833_v21 = vpack.c.bf16 %v93_v20, %v92_v19  ;;  %v95_v23 = vld [vmem:[%s1223_s8 + $0x18] sm:$0xff]  ;;  %v712_v30 = vld [vmem:[#allocation7] ss:$0 sm:$0xff]  ;;  %v296_v31 = vsub.s32 %v293_v28, %v295_v29  ;;  %v714_v36 = vld [vmem:[%s1220_s5] ss:$0 sm:$0xff]  ;;  %p959_p4 = scmp.ne.s32.totalorder %s702_s6, %s958_s23  ;;  %p964_p6 = scmp.lt.s32.totalorder %s958_s23, %s958_s23 }
  0x51   :  { %830 = vmatprep.subr.bf16.mxu1 %v829_v13  ;;  %v837_v24 = vpack.c.bf16 %v95_v23, %v94_v22  ;;  %v96_v55 = vld [vmem:[%s1224_s9] sm:$0xf] }
  0x52   :  { %824 = vmatpush3.bf16.msra.mxu0 %v823_v12  ;;  %p965_p7 = por %p964_p6, %p963_p5 }
  0x53   :  { %834 = vmatprep.subr.bf16.mxu0 %v833_v21 }
  0x54   :  { %832 = vmatpush3.bf16.msra.mxu1 %v829_v13  ;;  %p966_p8 = pnand %p965_p7, %p959_p4 }
  0x55   :  { %770 = vmatmul.mubr.msk.f32.vlgmr.msra.gmra.mrb[0].mxu0 %vm108_vm1, %v87_v15  ;;  %800 = vmatprep.subr.msk.mxu1 %vm495_vm2, %v96_v55 }
  0x56   :  { %836 = vmatpush3.bf16.msra.mxu0 %v833_v21 }
  0x57   :  { %781 = vmatmul.mubr.msk.f32.vlgmr.msra.gmra.mrb[0].mxu1 %vm108_vm1, %v89_v16  ;;  %838 = vmatprep.subr.bf16.mxu0 %v837_v24 }
  0x58   :  { %783 = vmatprep.mubr.msk.f32.mxu1 %vm108_vm1, %v90_v17  ;;  %801 = vmatpush3.msk.msra.mxu1 %vm495_vm2, %v96_v55 }
  0x5a   :  { %840 = vmatpush3.bf16.msra.mxu0 %v837_v24 }
  0x5b   :  { %784 = vmatmul.mubr.msk.f32.gmra.mrb[2].mxu1 %vm108_vm1, %v91_v18  ;;  %841 = vmatprep.subr.bf16.mxu0 %v994_v0 }
 0x128   :  { %v178_v32 = vpop.f32.mrb[0].mxu0 }
 0x129   :  { %v179_v33 = vadd.f32 %v712_v30, %v178_v32  ;;  %v771_v34 = vpop.f32.mrb[1].mxu0 }
 0x12a   :  { %v782_v35 = vpop.f32.mrb[0].mxu1 }
 0x12b   :  { %v297_v37 = vrot.slane %v179_v33, %v296_v31  ;;  %v271_v39 = vpop.f32.mrb[1].mxu1  ;;  %v1157_v42 = vadd.f32 %v782_v35, %v714_v36 }
 0x12c   :  { %v1159_v43 = vadd.f32 %v714_v36, %v271_v39 }
 0x12d   :  { %v298_v40 = vcombine.high %v297_v37, %v297_v37  ;;  %v305_v41 = vrot.slane %v297_v37, %v296_v31 }
 0x12e   :  { %v785_v44 = vpop.f32.mrb[2].mxu1 }
 0x12f   :  { %v316_v45 = vrot.slane %v305_v41, %v315_v38  ;;  %v312_v46 = vrot.slane %v298_v40, %v296_v31  ;;  %v281_v47 = vpop.f32.mrb[3].mxu1  ;;  %v1165_v52 = vadd.f32 %v785_v44, %v714_v36 }
 0x130   :  { %v1161_v48 = vadd.f32 %v714_v36, %v281_v47 }
 0x131   :  { %v324_v49 = vmul.f32 %v316_v45, %v1157_v42  ;;  %v323_v50 = vmul.f32 %v316_v45, %v1159_v43  ;;  %v320_v51 = vrot.slane %v312_v46, %v315_v38 }
 0x133   :  { %v325_v53 = vmul.f32 %v320_v51, %v1161_v48  ;;  %794 = vmatprep.mubr.msk.f32.mxu0 %vm108_vm1, %v323_v50  ;;  %v326_v54 = vmul.f32 %v320_v51, %v1165_v52 }
 0x134   :  { %795 = vmatmul.mubr.msk.f32.vlgmr.msra.gmra.mrb[2].mxu0 %vm108_vm1, %v324_v49 }
 0x135   :  { %797 = vmatprep.mubr.msk.f32.mxu0 %vm108_vm1, %v325_v53 }
 0x138   :  { %798 = vmatmul.mubr.msk.f32.gmra.mrb[4].mxu0 %vm108_vm1, %v326_v54 }
 0x139   :  { %816 = vmatprep.mubr.msk.f32.mxu0 %vm995_vm0, %v996_v1 }
 0x207   :  { %v796_v56 = vpop.f32.mrb[2].mxu0 }
 0x208   :  { %v425_v57 = vmul.f32 0.35355338, %v796_v56  ;;  %v405_v58 = vpop.f32.mrb[3].mxu0 }
 0x209   :  { %v424_v59 = vmul.f32 0.35355338, %v405_v58 }
 0x20a   :  { %v430_v60 = vsel %vm428_vm3, %v425_v57, -inf }
 0x20b   :  { %v429_v61 = vsel %vm428_vm3, %v424_v59, -inf  ;;  %v799_v62 = vpop.f32.mrb[4].mxu0 }
 0x20c   :  { %v431_v63 = vmax.f32 %v429_v61, %v430_v60  ;;  %v427_v2 = vmul.f32 0.35355338, %v799_v62  ;;  %v415_v1 = vpop.f32.mrb[5].mxu0  ;;  %v607_v60 = vld [vmem:[#allocation8 + $0x8] sm:$0xff]  ;;  %v608_v62 = vld [vmem:[#allocation8 + $0x10] sm:$0xff] }
 0x20d   :  { %v426_v3 = vmul.f32 0.35355338, %v415_v1 }
 0x20e   :  { %v432_v4 = vrot.slane %v431_v63, 4  ;;  %v439_v5 = vsel %vm428_vm3, %v427_v2, -inf }
 0x20f   :  { %v438_v6 = vsel %vm428_vm3, %v426_v3, -inf }
 0x210   :  { %v433_v7 = vmax.f32 %v431_v63, %v432_v4  ;;  %v440_v8 = vmax.f32 %v438_v6, %v439_v5  ;;  %v609_v63 = vld [vmem:[#allocation8 + $0x18] sm:$0xff] }
 0x212   :  { %v434_v9 = vrot.slane %v433_v7, 2  ;;  %v441_v10 = vrot.slane %v440_v8, 4 }
 0x214   :  { %v435_v11 = vmax.f32 %v433_v7, %v434_v9  ;;  %v442_v12 = vmax.f32 %v440_v8, %v441_v10 }
 0x216   :  { %v436_v13 = vrot.slane %v435_v11, 1  ;;  %v443_v14 = vrot.slane %v442_v12, 2 }
 0x218   :  { %v437_v15 = vmax.f32 %v435_v11, %v436_v13  ;;  %v444_v16 = vmax.f32 %v442_v12, %v443_v14 }
 0x21a   :  { %v447_v17 = vsub.f32 %v424_v59, %v437_v15  ;;  %v448_v18 = vsub.f32 %v425_v57, %v437_v15  ;;  %v445_v19 = vrot.slane %v444_v16, 1  ;;  %v606_v59 = vld [vmem:[#allocation8] sm:$0xff] }
 0x21b   :  { %v842_v61 = vpack.c.bf16 %v607_v60, %v606_v59 }
 0x21c   :  { %v451_v20 = vmul.f32 1.442695, %v447_v17  ;;  %v453_v21 = vmul.f32 1.442695, %v448_v18  ;;  %v446_v22 = vmax.f32 %v444_v16, %v445_v19 }
 0x21d   :  { %843 = vmatpush3.bf16.msra.mxu0 %v842_v61 }
 0x21e   :  { %858 = vpow2.f32 %v451_v20  ;;  %v449_v23 = vsub.f32 %v426_v3, %v446_v22  ;;  %v450_v24 = vsub.f32 %v427_v2, %v446_v22  ;;  %844 = vmatprep.subr.bf16.mxu0 %v994_v0  ;;  %v845_v2 = vpack.c.bf16 %v609_v63, %v608_v62 }
 0x21f   :  { %860 = vpow2.f32 %v453_v21 }
 0x220   :  { %v455_v25 = vmul.f32 1.442695, %v449_v23  ;;  %v457_v26 = vmul.f32 1.442695, %v450_v24 }
 0x221   :  { %846 = vmatpush3.bf16.msra.mxu0 %v845_v2 }
 0x222   :  { %862 = vpow2.f32 %v455_v25 }
 0x223   :  { %864 = vpow2.f32 %v457_v26 }
 0x228   :  { %v859_v27 = vpop.eup %858 }
 0x229   :  { %v861_v28 = vpop.eup %860  ;;  %v459_v29 = vsel %vm428_vm3, %v859_v27, 0.0 }
 0x22a   :  { %v460_v30 = vsel %vm428_vm3, %v861_v28, 0.0 }
 0x22b   :  { %v461_v31 = vadd.f32 %v460_v30, %v459_v29 }
 0x22c   :  { %v863_v32 = vpop.eup %862 }
 0x22d   :  { %v865_v33 = vpop.eup %864  ;;  %v462_v34 = vrot.slane %v461_v31, 4  ;;  %v468_v35 = vsel %vm428_vm3, %v863_v32, 0.0 }
 0x22e   :  { %v469_v36 = vsel %vm428_vm3, %v865_v33, 0.0 }
 0x22f   :  { %v463_v37 = vadd.f32 %v462_v34, %v461_v31  ;;  %v470_v38 = vadd.f32 %v469_v36, %v468_v35 }
 0x231   :  { %v464_v39 = vrot.slane %v463_v37, 2  ;;  %v471_v40 = vrot.slane %v470_v38, 4 }
 0x233   :  { %v465_v41 = vadd.f32 %v464_v39, %v463_v37  ;;  %v472_v44 = vadd.f32 %v471_v40, %v470_v38 }
 0x235   :  { %v473_v45 = vrot.slane %v472_v44, 2  ;;  %v466_v46 = vrot.slane %v465_v41, 1 }
 0x237   :  { %v474_v47 = vadd.f32 %v473_v45, %v472_v44  ;;  %v467_v49 = vadd.f32 %v466_v46, %v465_v41 }
 0x239   :  { %866 = vrcp.f32 %v467_v49  ;;  %v475_v50 = vrot.slane %v474_v47, 1 }
 0x23b   :  { %v476_v51 = vadd.f32 %v475_v50, %v474_v47 }
 0x23d   :  { %868 = vrcp.f32 %v476_v51 }
 0x243   :  { %v867_v53 = vpop.eup %866 }
 0x244   :  { %v479_v54 = vmul.f32 %v867_v53, %v859_v27  ;;  %v480_v55 = vmul.f32 %v867_v53, %v861_v28 }
 0x246   :  { %802 = vmatprep.mubr.msk.f32.mxu1 %vm428_vm3, %v479_v54 }
 0x247   :  { %v869_v56 = vpop.eup %868  ;;  %803 = vmatmul.mubr.msk.f32.vlgmr.msra.gmra.mrb[4].mxu1 %vm428_vm3, %v480_v55 }
 0x248   :  { %v481_v57 = vmul.f32 %v869_v56, %v863_v32  ;;  %v482_v58 = vmul.f32 %v869_v56, %v865_v33 }
 0x24a   :  { %805 = vmatprep.mubr.msk.f32.mxu1 %vm428_vm3, %v481_v57 }
 0x24b   :  { %806 = vmatmul.mubr.msk.f32.gmra.mrb[6].mxu1 %vm428_vm3, %v482_v58 }
 0x31a   :  { %v804_v1 = vpop.f32.mrb[4].mxu1 }
 0x31b   :  { %v585_v3 = vmul.f32 %v804_v1, %v1157_v42  ;;  %v565_v4 = vpop.f32.mrb[5].mxu1 }
 0x31c   :  { %v584_v5 = vmul.f32 %v565_v4, %v1159_v43 }
 0x31d   :  { %v589_v6 = vsel %vm108_vm1, %v585_v3, 0.0 }
 0x31e   :  { %v588_v7 = vsel %vm108_vm1, %v584_v5, 0.0  ;;  %v807_v8 = vpop.f32.mrb[6].mxu1 }
 0x31f   :  { %v590_v9 = vadd.f32 %v589_v6, %v588_v7  ;;  %v587_v10 = vmul.f32 %v807_v8, %v1165_v52  ;;  %v575_v11 = vpop.f32.mrb[7].mxu1 }
 0x320   :  { %v586_v0 = vmul.f32 %v575_v11, %v1161_v48  ;;  %v728_v48 = vld [vmem:[%s1222_s7] ss:$0 sm:$0xff] }
 0x321   :  { %v591_v12 = vrot.slane %v590_v9, 4  ;;  %v598_v13 = vsel %vm108_vm1, %v587_v10, 0.0 }
 0x322   :  { %v597_v14 = vsel %vm108_vm1, %v586_v0, 0.0 }
 0x323   :  { %v592_v42 = vadd.f32 %v591_v12, %v590_v9  ;;  %v599_v15 = vadd.f32 %v598_v13, %v597_v14 }
 0x325   :  { %v593_v16 = vrot.slane %v592_v42, 2  ;;  %v600_v43 = vrot.slane %v599_v15, 4 }
 0x327   :  { %v594_v17 = vadd.f32 %v593_v16, %v592_v42  ;;  %v601_v18 = vadd.f32 %v600_v43, %v599_v15 }
 0x329   :  { %v602_v19 = vrot.slane %v601_v18, 2  ;;  %v595_v20 = vrot.slane %v594_v17, 1 }
 0x32b   :  { %v603_v21 = vadd.f32 %v602_v19, %v601_v18  ;;  %v596_v52 = vadd.f32 %v595_v20, %v594_v17 }
 0x32d   :  { %v604_v22 = vrot.slane %v603_v21, 1 }
 0x32f   :  { %v605_v23 = vadd.f32 %v604_v22, %v603_v21 }
 0x331   :  { %v620_v24 = vsel %vm619_vm4, %v605_v23, %v596_v52 }
 0x332   :  { %817 = vmatmul.mubr.msk.f32.vlgmr.msra.gmra.mrb[6].mxu0 %vm108_vm1, %v620_v24 }
 0x405   :  { %v689_v25 = vpop.f32.mrb[6].mxu0 }
 0x406   :  { %v690_v26 = vadd.f32 %v728_v48, %v689_v25  ;;  %v818_v27 = vpop.f32.mrb[7].mxu0 }
 0x408   :  { %694 = vst.msk [vmem:[#allocation10] sm:$0x3] %vm693_vm5, %v690_v26 }
 0x409   :  { %969 = shalt.err (!%p966_p8)
}
 0x40a   :  { %s970_s27 = scalar_lea.hbm %s1225_s10, 32 }
 0x40b   :  { %p971_p9 = scmp.ne.s32.totalorder %s1225_s10, %s970_s27  ;;  %p974_p10 = scmp.lt.u32.totalorder %s970_s27, %s1225_s10 }
 0x40d   :  { %p976_p11 = pnand %p974_p10, %p971_p9 }
 0x40f   :  { %979 = shalt.err (!%p976_p11)
}
 0x410   :  { %704 = dma.vmem_to_hbm [thread:$0]  %s702_s6, 32, %s1225_s10, [#allocation4]  }
 0x411   :  { %986 = dma.done.wait [#allocation4], 32  }
 0x412   :  { %987 = vsyncadd [#allocation4], 4294967264 }
 0x413   :  { %708 = vsyncpa [#allocation3], 1 }
 0x414   :  { %709 = vsyncpa [#allocation6], 1 }
 0x415   :  { %710 = vsyncpa [#allocation9], 1 }
 0x416   :  { %711 = vsyncpa [#allocation4], 1 }

</bundles_post_ra>
